<compile_context>
chip_gen: v7x
topology: tpu7x:2x2x1
jax: 0.10.0
libtpu: 0.0.40
codegen_flags: <defaults>
</compile_context>

<pallas_src>
import functools

import jax
import jax.numpy as jnp
from jax import lax
from jax.experimental import pallas as pl
from jax.experimental.pallas import tpu as pltpu

_COS_EPS = 1e-8  # matches torch.nn.functional.cosine_similarity default eps


def _distill_kernel(x_ref, y_ref, sq_ref, sim_ref, *, n_valid, tt):
    """One (1, tt, D) time tile of one batch row -> per-tile partial sums."""
    t = pl.program_id(1)

    x = x_ref[0].astype(jnp.float32)   # (tt, D)
    y = y_ref[0].astype(jnp.float32)   # (tt, D)

    # Global-time validity mask: rows with global index >= n are either the
    # longer tensor's extra steps or block padding / stale VMEM. Select them
    # away with jnp.where (NaN/Inf safe); never multiply garbage.
    t_idx = lax.broadcasted_iota(jnp.int32, (tt, 1), 0) + t * tt
    valid = t_idx < n_valid            # (tt, 1) bool

    # --- MSE partial: sum over this tile of (x - y)^2, lane-dense (1, D) ---
    d = x - y
    sq = jnp.where(valid, d * d, 0.0)                       # (tt, D)
    sq_ref[0, 0] = jnp.sum(sq, axis=0, keepdims=True)       # (1, D)

    # --- per-row cosine similarity, then -log(sigmoid(cos)) = softplus(-cos) ---
    dot = jnp.sum(x * y, axis=-1, keepdims=True)            # (tt, 1)
    nx2 = jnp.sum(x * x, axis=-1, keepdims=True)            # (tt, 1)
    ny2 = jnp.sum(y * y, axis=-1, keepdims=True)            # (tt, 1)
    # cos = dot / max(|x||y|, eps) == dot * rsqrt(max(|x|^2 |y|^2, eps^2))
    cos = dot * lax.rsqrt(jnp.maximum(nx2 * ny2, _COS_EPS * _COS_EPS))
    sim = jnp.where(valid, jnp.log1p(jnp.exp(-cos)), 0.0)   # (tt, 1)
    sim_ref[0, 0] = jnp.sum(sim, axis=0, keepdims=True)     # (1, 1)


def t_axis_distill_loss(feature, target_feature, lambda_sim=1.0):
    """Pallas implementation of the PyTorch t_axis_distill_loss.forward."""
    n = min(feature.shape[1], target_feature.shape[1])
    B, _, D = feature.shape
    assert target_feature.shape[0] == B and target_feature.shape[2] == D

    # Time-tile size: largest sublane-aligned tile such that
    # 2 inputs x 2 pipeline buffers x (tt * D * itemsize) stays well inside the
    # scoped VMEM limit on every generation (incl. v7x's smaller VMEM).
    itemsize = max(jnp.dtype(feature.dtype).itemsize,
                   jnp.dtype(target_feature.dtype).itemsize)
    per_buffer_budget = 2 * 1024 * 1024              # bytes / input / pipeline buffer
    tt = per_buffer_budget // max(1, D * itemsize)
    tt = min(tt, 8192)                               # diminishing returns beyond this
    tt = min(tt, ((n + 7) // 8) * 8)                 # never exceed padded time extent
    tt = max(8, (tt // 8) * 8)                       # sublane-aligned

    n_t = pl.cdiv(n, tt)
    grid = (B, n_t)
    kernel = functools.partial(_distill_kernel, n_valid=n, tt=tt)

    sq_part, sim_part = pl.pallas_call(
        kernel,
        out_shape=(jax.ShapeDtypeStruct((B, n_t, 1, D), jnp.float32),
                   jax.ShapeDtypeStruct((B, n_t, 1, 1), jnp.float32)),
        grid_spec=pltpu.PrefetchScalarGridSpec(
            num_scalar_prefetch=0,
            grid=grid,
            in_specs=[pl.BlockSpec((1, tt, D), lambda b, t: (b, t, 0)),
                      pl.BlockSpec((1, tt, D), lambda b, t: (b, t, 0))],
            out_specs=(pl.BlockSpec((1, 1, 1, D), lambda b, t: (b, t, 0, 0)),
                       pl.BlockSpec((1, 1, 1, 1), lambda b, t: (b, t, 0, 0))),
        ),
        compiler_params=pltpu.CompilerParams(
            dimension_semantics=("parallel", "parallel"),
            vmem_limit_bytes=32 * 1024 * 1024),
    )(feature, target_feature)

    # Tiny epilogue reductions + normalization in plain JAX.
    l1_loss = jnp.sum(sq_part) / (B * n * D)     # mse_loss, reduction='mean'
    sim_loss = jnp.sum(sim_part) / (B * n)       # mean over (B, n)
    return l1_loss + lambda_sim * sim_loss


def _reference(feature, target_feature, lambda_sim=1.0):
    n = min(feature.shape[1], target_feature.shape[1])
    x = feature[:, :n].astype(jnp.float32)
    y = target_feature[:, :n].astype(jnp.float32)
    l1 = jnp.mean((x - y) ** 2)
    dot = jnp.sum(x * y, axis=-1)
    nx = jnp.sqrt(jnp.sum(x * x, axis=-1))
    ny = jnp.sqrt(jnp.sum(y * y, axis=-1))
    cos = dot / jnp.maximum(nx * ny, _COS_EPS)
    sim = jnp.mean(jnp.log1p(jnp.exp(-cos)))
    return l1 + lambda_sim * sim


if __name__ == "__main__":
    key = jax.random.PRNGKey(0)
    k1, k2, k3, k4 = jax.random.split(key, 4)

    # Case 1: feature (B=2, T=8, D=32), target (B=2, T=10, D=32) -> n = 8.
    feature = jax.random.normal(k1, (2, 8, 32), dtype=jnp.float32)
    target_feature = jax.random.normal(k2, (2, 10, 32), dtype=jnp.float32)
    loss = jax.block_until_ready(
        t_axis_distill_loss(feature, target_feature, lambda_sim=1.0))
    ref = _reference(feature, target_feature, lambda_sim=1.0)
    assert jnp.allclose(loss, ref, rtol=1e-4, atol=1e-5), (loss, ref)

    # Case 2: ragged n (= 13, not a multiple of the tile) exercises masking.
    feature2 = jax.random.normal(k3, (2, 13, 32), dtype=jnp.float32)
    target_feature2 = jax.random.normal(k4, (2, 20, 32), dtype=jnp.float32)
    loss2 = jax.block_until_ready(
        t_axis_distill_loss(feature2, target_feature2, lambda_sim=0.5))
    ref2 = _reference(feature2, target_feature2, lambda_sim=0.5)
    assert jnp.allclose(loss2, ref2, rtol=1e-4, atol=1e-5), (loss2, ref2)

    print("KERNEL_OK")
</pallas_src>

<mosaic_0001>
module attributes {stable_mosaic.version = 11 : i64} {
  func.func @_distill_kernel(%arg0: i32, %arg1: i32, %arg2: memref<1x8x32xf32, #tpu.memory_space<vmem>>, %arg3: memref<1x8x32xf32, #tpu.memory_space<vmem>>, %arg4: memref<1x1x1x32xf32, #tpu.memory_space<vmem>>, %arg5: memref<1x1x1x1xf32, #tpu.memory_space<vmem>>) attributes {dimension_semantics = [#tpu.dimension_semantics<parallel>, #tpu.dimension_semantics<parallel>], iteration_bounds = array<i64: 2, 1>, scalar_prefetch = 0 : i64, scratch_operands = 0 : i64, tpu.core_type = #tpu.core_type<tc>, window_params = [{transform_indices = @transform_0, window_bounds = array<i64: 1, 8, 32>}, {transform_indices = @transform_1, window_bounds = array<i64: 1, 8, 32>}, {transform_indices = @transform_2, window_bounds = array<i64: 1, 1, 1, 32>}, {transform_indices = @transform_3, window_bounds = array<i64: 1, 1, 1, 1>}]} {
    %c0 = arith.constant 0 : index
    %c0_0 = arith.constant 0 : index
    %c0_1 = arith.constant 0 : index
    %0 = vector.load %arg2[%c0, %c0_0, %c0_1] : memref<1x8x32xf32, #tpu.memory_space<vmem>>, vector<1x8x32xf32>
    %1 = vector.shape_cast %0 : vector<1x8x32xf32> to vector<8x32xf32>
    %c0_2 = arith.constant 0 : index
    %c0_3 = arith.constant 0 : index
    %c0_4 = arith.constant 0 : index
    %2 = vector.load %arg3[%c0_2, %c0_3, %c0_4] : memref<1x8x32xf32, #tpu.memory_space<vmem>>, vector<1x8x32xf32>
    %3 = vector.shape_cast %2 : vector<1x8x32xf32> to vector<8x32xf32>
    %4 = tpu.iota {dimensions = array<i32: 0>} : vector<8x1xi32>
    %c8_i32 = arith.constant 8 : i32
    %5 = arith.muli %arg1, %c8_i32 : i32
    %6 = vector.broadcast %5 : i32 to vector<8x1xi32>
    %7 = arith.addi %4, %6 : vector<8x1xi32>
    %c8_i32_5 = arith.constant 8 : i32
    %8 = vector.broadcast %c8_i32_5 : i32 to vector<8x1xi32>
    %9 = arith.cmpi slt, %7, %8 : vector<8x1xi32>
    %10 = arith.subf %1, %3 : vector<8x32xf32>
    %11 = arith.mulf %10, %10 : vector<8x32xf32>
    %cst = arith.constant 0.000000e+00 : f32
    %12 = vector.shape_cast %9 : vector<8x1xi1> to vector<8x1xi1>
    %13 = vector.broadcast %12 : vector<8x1xi1> to vector<8x32xi1>
    %14 = vector.broadcast %cst : f32 to vector<8x32xf32>
    %15 = arith.select %13, %11, %14 : vector<8x32xi1>, vector<8x32xf32>
    %cst_6 = arith.constant dense<0.000000e+00> : vector<32xf32>
    %16 = vector.multi_reduction <add>, %15, %cst_6 [0] : vector<8x32xf32> to vector<32xf32>
    %17 = vector.shape_cast %16 : vector<32xf32> to vector<1x32xf32>
    %c0_7 = arith.constant 0 : index
    %c0_8 = arith.constant 0 : index
    %c0_9 = arith.constant 0 : index
    %c0_10 = arith.constant 0 : index
    %18 = vector.load %arg4[%c0_7, %c0_8, %c0_9, %c0_10] : memref<1x1x1x32xf32, #tpu.memory_space<vmem>>, vector<1x1x1x32xf32>
    %19 = vector.shape_cast %18 : vector<1x1x1x32xf32> to vector<1x32xf32>
    %20 = vector.shape_cast %17 : vector<1x32xf32> to vector<1x1x1x32xf32>
    tpu.vector_store %arg4[%c0_7, %c0_8, %c0_9, %c0_10], %20 {strides = array<i32>} : memref<1x1x1x32xf32, #tpu.memory_space<vmem>>, vector<1x1x1x32xf32>,
    %21 = arith.mulf %1, %3 : vector<8x32xf32>
    %cst_11 = arith.constant dense<0.000000e+00> : vector<8xf32>
    %22 = vector.multi_reduction <add>, %21, %cst_11 [1] : vector<8x32xf32> to vector<8xf32>
    %23 = vector.shape_cast %22 : vector<8xf32> to vector<8x1xf32>
    %24 = arith.mulf %1, %1 : vector<8x32xf32>
    %cst_12 = arith.constant dense<0.000000e+00> : vector<8xf32>
    %25 = vector.multi_reduction <add>, %24, %cst_12 [1] : vector<8x32xf32> to vector<8xf32>
    %26 = vector.shape_cast %25 : vector<8xf32> to vector<8x1xf32>
    %27 = arith.mulf %3, %3 : vector<8x32xf32>
    %cst_13 = arith.constant dense<0.000000e+00> : vector<8xf32>
    %28 = vector.multi_reduction <add>, %27, %cst_13 [1] : vector<8x32xf32> to vector<8xf32>
    %29 = vector.shape_cast %28 : vector<8xf32> to vector<8x1xf32>
    %30 = arith.mulf %26, %29 : vector<8x1xf32>
    %cst_14 = arith.constant 1.000000e-16 : f32
    %31 = vector.broadcast %cst_14 : f32 to vector<8x1xf32>
    %32 = arith.maximumf %30, %31 : vector<8x1xf32>
    %33 = math.rsqrt %32 : vector<8x1xf32>
    %34 = arith.mulf %23, %33 : vector<8x1xf32>
    %cst_15 = arith.constant 0.000000e+00 : f32
    %35 = vector.broadcast %cst_15 : f32 to vector<8x1xf32>
    %36 = arith.subf %35, %34 : vector<8x1xf32>
    %37 = math.exp %36 : vector<8x1xf32>
    %38 = math.log1p %37 : vector<8x1xf32>
    %cst_16 = arith.constant 0.000000e+00 : f32
    %39 = vector.broadcast %cst_16 : f32 to vector<8x1xf32>
    %40 = arith.select %9, %38, %39 : vector<8x1xi1>, vector<8x1xf32>
    %cst_17 = arith.constant dense<0.000000e+00> : vector<1xf32>
    %41 = vector.multi_reduction <add>, %40, %cst_17 [0] : vector<8x1xf32> to vector<1xf32>
    %42 = vector.shape_cast %41 : vector<1xf32> to vector<1x1xf32>
    %c0_18 = arith.constant 0 : index
    %c0_19 = arith.constant 0 : index
    %c0_20 = arith.constant 0 : index
    %c0_21 = arith.constant 0 : index
    %43 = vector.load %arg5[%c0_18, %c0_19, %c0_20, %c0_21] : memref<1x1x1x1xf32, #tpu.memory_space<vmem>>, vector<1x1x1x1xf32>
    %44 = vector.shape_cast %43 : vector<1x1x1x1xf32> to vector<1x1xf32>
    %45 = vector.shape_cast %42 : vector<1x1xf32> to vector<1x1x1x1xf32>
    tpu.vector_store %arg5[%c0_18, %c0_19, %c0_20, %c0_21], %45 {strides = array<i32>} : memref<1x1x1x1xf32, #tpu.memory_space<vmem>>, vector<1x1x1x1xf32>,
    return
  }
  func.func @transform_0(%arg0: i32, %arg1: i32) -> (i32, i32, i32) {
    %c0_i32 = arith.constant 0 : i32
    %c0_i32_0 = arith.constant 0 : i32
    return %arg0, %arg1, %c0_i32 : i32, i32, i32
  }
  func.func @transform_1(%arg0: i32, %arg1: i32) -> (i32, i32, i32) {
    %c0_i32 = arith.constant 0 : i32
    %c0_i32_0 = arith.constant 0 : i32
    return %arg0, %arg1, %c0_i32 : i32, i32, i32
  }
  func.func @transform_2(%arg0: i32, %arg1: i32) -> (i32, i32, i32, i32) {
    %c0_i32 = arith.constant 0 : i32
    %c0_i32_0 = arith.constant 0 : i32
    %c0_i32_1 = arith.constant 0 : i32
    return %arg0, %arg1, %c0_i32, %c0_i32_0 : i32, i32, i32, i32
  }
  func.func @transform_3(%arg0: i32, %arg1: i32) -> (i32, i32, i32, i32) {
    %c0_i32 = arith.constant 0 : i32
    %c0_i32_0 = arith.constant 0 : i32
    %c0_i32_1 = arith.constant 0 : i32
    return %arg0, %arg1, %c0_i32, %c0_i32_0 : i32, i32, i32, i32
  }
}

</mosaic_0001>

<bundles_post_ra>
// kernel: tpu_custom_call.1
= control target key start
LH: loop header
LB: loop body
LE: loop exit
PB: predicated region body
PF: predicated region fallthrough
CT: control target
= control target key end

     0   :  { %9 = vsyncpa [#allocation3], 0  ;;  %s723_s0 = inlined_call_operand.vmem [shape: f32[2,8,32], index: 0, kind: input, shape index: {}]   ;;  %s724_s1 = inlined_call_operand.vmem [shape: f32[2,10,32], index: 1, kind: input, shape index: {}]   ;;  %s725_s2 = inlined_call_operand.hbm [shape: f32[2,1,1,32], index: 2, kind: output, shape index: {0}]   ;;  %s726_s3 = inlined_call_operand.vmem [shape: f32[2,1,1,1], index: 3, kind: output, shape index: {1}]  }
   0x1   :  { %11 = vsyncpa [#allocation3 + $0x1], 0  ;;  %s606_s12 = smov 0   ;;  %s608_s13 = smov 0  }
   0x2   :  { %s610_s14 = smov 0   ;;  %s612_s15 = smov 0  }
   0x3   :  { %s614_s16 = smov 0   ;;  %s616_s17 = smov 0  }
   0x4 LB: > { %s432_s18 = sadd.s32 4294967295, %s583_s17   ;;  %s433_s19 = sadd.s32 4294967294, %s583_s17   ;;  %s583_s17 = sphi %s616_s17, %s17_s17   ;;  %s579_s16 = sphi %s614_s16, %s733_s16   ;;  %s575_s15 = sphi %s612_s15, %s732_s15   ;;  %s571_s14 = sphi %s610_s14, %s731_s14   ;;  %s567_s13 = sphi %s608_s13, %s730_s13   ;;  %s563_s12 = sphi %s606_s12, %s729_s12  }
   0x5   : > { %s29_s20 = sadd.s32 1, %s579_s16  ;;  %s94_s21 = sadd.s32 1, %s571_s14 }
   0x6   : > { %p31_p0 = scmp.ge.s32.totalorder %s29_s20, 2  ;;  %p104_p1 = scmp.ne.s32.totalorder %s571_s14, %s567_s13 }
   0x7   : > { %p105_p2 = scmp.eq.s32.totalorder %s432_s18, 1  ;;  %p110_p3 = scmp.ne.s32.totalorder %s567_s13, %s563_s12 }
   0x8   : > { %s735_s20 = smov (%p31_p0, %s29_s20), 0  ;;  %p111_p5 = scmp.eq.s32.totalorder %s433_s19, 1 }
   0x9   : > { %p646_p4 = por %p105_p2, %p104_p1  ;;  %s89_s23 = ssub.s32 %s579_s16, %s735_s20 }
   0xa   : > { %p436_p6 = scmp.ge.s32.totalorder %s583_s17, 1  ;;  %p92_p7 = scmp.eq.s32.totalorder %s89_s23, 0 }
   0xb   : > { %p653_p8 = por %p111_p5, %p110_p3  ;;  %p178_p9 = scmp.lt.s32.totalorder %s583_s17, 3 }
   0xc   : > { %s659_s25 = scalar_select %p92_p7, %s571_s14, %s94_s21  }
   0xd   : > { %p179_p10 = pnand %p436_p6, %p178_p9 }
   0xe   : > { %p217_p11 = scmp.lt.s32.totalorder (!%p179_p10), %s575_s15, 1  ;;  %vm251_vm0 = vcmask (!%p179_p10), 261120   ;;  %s207_s8 = sand.u32 (!%p179_p10), 1, %s567_s13   ;;  %vm259_vm1 = vcmask (!%p179_p10), 253952  }
   0xf   : > { %182 = sbr.rel (%p179_p10) target bundleno = 237 (0xed), region = 28  ;;  %s440_s9 = sshll.u32 (!%p179_p10), %s575_s15, 4 }
  0x10   : > { %s208_s10 = scalar_lea.vmem (!%p179_p10), [#allocation2], %s207_s8  ;;  %s678_s21 = scalar_lea.hbm (!%p179_p10), %s725_s2, %s440_s9 }
  0x11   : > { %s318_s11 = sshll.u32 (!%p179_p10), %s208_s10, 4  ;;  %s299_s23 = scalar_lea.sflag (!%p179_p10), [#allocation3], %s207_s8  ;;  %s319_s11 = int_to_ptr.vmem [resolvable:$true] %s318_s11 }
  0x12   : > { %s585_s28 = smov (!%p179_p10), [#allocation2]  }
  0x13   : > { %s509_s29 = sshll.u32 (!%p179_p10), %s585_s28, 4  ;;  %s510_s29 = int_to_ptr.vmem [resolvable:$false] %s509_s29 }
  0x14   : > { %p512_p1 = scmp.lt.s32.totalorder (!%p179_p10), %s319_s11, %s510_s29 }
  0x16   : > { %s663_s26 = scalar_select %p217_p11, %s575_s15, 1 }
  0x18   : > { %s437_s27 = sshll.u32 %s663_s26, 3  ;;  %s443_s4 = sshll.u32 %s663_s26, 4 }
  0x19   : > { %s223_s30 = scalar_lea.vmem %s723_s0, %s437_s27  ;;  %s231_s7 = scalar_lea.vmem %s724_s1, %s443_s4 }
  0x1a   : > { %v238_v0 = vld [vmem:[%s223_s30] sm:$0xff]  ;;  %s505_s27 = scalar_lea.vmem %s319_s11, 16  ;;  %s511_s30 = scalar_lea.vmem %s510_s29, 32 }
  0x1b   : > { %v265_v1 = vmul.f32 %v238_v0, %v238_v0  ;;  %v239_v2 = vld [vmem:[%s231_s7] sm:$0xff]  ;;  %p506_p12 = scmp.ne.s32.totalorder %s319_s11, %s505_s27  ;;  %p513_p2 = scmp.lt.s32.totalorder %s511_s30, %s505_s27 }
  0x1c   : > { %v269_v3 = vmul.f32 %v239_v2, %v239_v2  ;;  %v261_v4 = vmul.f32 %v239_v2, %v238_v0  ;;  %v246_v8 = vsub.f32 %v238_v0, %v239_v2 }
  0x1d   : > { %v266_v5 = vsel %vm251_vm0, %v265_v1, 0.0  ;;  %p507_p13 = pnand %p506_p12, %p646_p4  ;;  %p514_p3 = por %p513_p2, %p512_p1 }
  0x1e   : > { %267 = vadd.xlane.f32.xlu0 %v266_v5  ;;  %v262_v6 = vsel %vm251_vm0, %v261_v4, 0.0  ;;  %v270_v7 = vsel %vm251_vm0, %v269_v3, 0.0  ;;  %v247_v9 = vmul.f32 %v246_v8, %v246_v8 }
  0x1f   : > { %263 = vadd.xlane.f32.xlu1 %v262_v6  ;;  %p508_p0 = pneg %p507_p13 }
  0x20   : > { %v252_v10 = vsel %vm251_vm0, %v247_v9, 0.0 }
  0x21   : > { %v253_v11 = vrot.slane %v252_v10, 4  ;;  %p515_p5 = pnand %p514_p3, %p508_p0 }
  0x22   : > { %271 = vadd.xlane.f32.xlu0 %v270_v7 }
  0x23   : > { %v254_v12 = vadd.f32 %v253_v11, %v252_v10 }
  0x25   : > { %v255_v13 = vrot.slane %v254_v12, 2 }
  0x27   : > { %v256_v14 = vadd.f32 %v255_v13, %v254_v12 }
  0x29   : > { %v257_v15 = vrot.slane %v256_v14, 1 }
  0x2b   : > { %v258_v16 = vadd.f32 %v257_v15, %v256_v14 }
  0x2d   : > { %260 = vst.msk [vmem:[%s208_s10] sm:$0x1] %vm259_vm1, %v258_v16 }
  0x2e   : > { %518 = shalt.err (!%p515_p5)
}
  0x2f   : > { %s519_s15 = scalar_lea.hbm %s678_s21, 16  ;;  %s523_s6 = scalar_lea.hbm %s725_s2, 32 }
  0x30   : > { %p520_p6 = scmp.ne.s32.totalorder %s678_s21, %s519_s15  ;;  %p524_p10 = scmp.lt.u32.totalorder %s678_s21, %s725_s2 }
  0x31   : > { %p525_p11 = scmp.lt.u32.totalorder %s523_s6, %s519_s15  ;;  %p527_p13 = scmp.lt.u32.totalorder %s519_s15, %s678_s21 }
  0x32   : > { %p521_p7 = pnand %p520_p6, %p646_p4 }
  0x33   : > { %p526_p12 = por %p525_p11, %p524_p10 }
  0x34   : > { %p522_p9 = pneg %p521_p7 }
  0x35   : > { %p528_p0 = por %p527_p13, %p526_p12 }
  0x37   : > { %p529_p1 = pnand %p528_p0, %p522_p9 }
  0x39   : > { %532 = shalt.err (!%p529_p1)
}
  0x3a   : > { %444 = dma.vmem_to_hbm [thread:$0]  (%p646_p4), %s319_s11, 16, %s678_s21, %s299_s23   ;;  %vm296_vm3 = vcmask 0  }
  0x3b   : > { %s237_s10 = scalar_lea.vmem %s726_s3, %s663_s26 }
  0xab   : > { %v268_v17 = vpop.xlane.xlu0 %267 }
  0xac   : > { %v264_v21 = vpop.xlane.xlu1 %263 }
  0xaf   : > { %v272_v18 = vpop.xlane.xlu0 %271 }
  0xb0   : > { %v273_v19 = vmul.f32 %v272_v18, %v268_v17 }
  0xb2   : > { %v274_v20 = vmax.f32 %v273_v19, 1e-16 }
  0xb4   : > { %499 = vrsqrt.f32 %v274_v20 }
  0xbe   : > { %v500_v22 = vpop.eup %499 }
  0xbf   : > { %v276_v23 = vmul.f32 %v500_v22, %v264_v21 }
  0xc1   : > { %v277_v24 = vsub.f32 0.0, %v276_v23 }
  0xc3   : > { %v278_v25 = vmul.f32 1.442695, %v277_v24 }
  0xc5   : > { %501 = vpow2.f32 %v278_v25 }
  0xcf   : > { %v502_v26 = vpop.eup %501 }
  0xd0   : > { %v280_v27 = vadd.f32 1.0, %v502_v26  ;;  %v283_v28 = vmul.f32 -0.5, %v502_v26  ;;  %v286_v30 = vand.u32 2147483647, %v502_v26 }
  0xd2   : > { %503 = vlog2.f32 %v280_v27  ;;  %v284_v29 = vadd.f32 1.0, %v283_v28  ;;  %vm287_vm2 = vcmp.lt.f32.partialorder %v286_v30, 0.0004427343 }
  0xd4   : > { %v285_v33 = vmul.f32 %v502_v26, %v284_v29 }
  0xdc   : > { %v504_v31 = vpop.eup %503 }
  0xdd   : > { %v282_v32 = vmul.f32 0.6931472, %v504_v31 }
  0xdf   : > { %v288_v34 = vsel %vm287_vm2, %v285_v33, %v282_v32 }
  0xe0   : > { %v290_v35 = vrot.slane %v288_v34, 4 }
  0xe2   : > { %v291_v36 = vadd.f32 %v290_v35, %v288_v34 }
  0xe4   : > { %v292_v37 = vrot.slane %v291_v36, 2 }
  0xe6   : > { %v293_v38 = vadd.f32 %v292_v37, %v291_v36 }
  0xe8   : > { %v294_v39 = vrot.slane %v293_v38, 1 }
  0xea   : > { %v295_v40 = vadd.f32 %v294_v39, %v293_v38 }
  0xec   : > { %297 = vst.msk [vmem:[%s237_s10] sm:$0x1] %vm296_vm3, %v295_v40 }
  0xed PF: > { %p450_p4 = scmp.ge.s32.totalorder %s583_s17, 2  ;;  %s333_s11 = sand.u32 1, %s563_s12  }
  0xee   : > { %s334_s18 = scalar_lea.sflag [#allocation3], %s333_s11 }
  0xef   : > { %p447_p2 = pnand %p450_p4, %p653_p8 }
  0xf1   : > { %558 = dma.done.wait (!%p447_p2), %s334_s18, 16  }
  0xf2   : > { %560 = vsyncadd (!%p447_p2), %s334_s18, 4294967280  ;;  %s17_s17 = sadd.s32 1, %s583_s17   ;;  %s729_s12 = smov %s567_s13 }
  0xf3   : > { %p14_p3 = scmp.ge.s32.totalorder %s17_s17, 4   ;;  %s730_s13 = smov %s571_s14 }
  0xf4   : > { %s731_s14 = smov %s659_s25  ;;  %s732_s15 = smov %s579_s16 }
  0xf5   : > { %s733_s16 = smov %s735_s20  ;;  %16 = sbr.rel (!%p14_p3) target bundleno = 4 (0x4), region = 78 }
  0xfc   :  { %347 = vsyncpa [#allocation3], 1 }
  0xfd   :  { %349 = vsyncpa [#allocation3 + $0x1], 1 }

</bundles_post_ra>
